<compile_context>
chip_gen: v5e
topology: v5e:2x2
jax: 0.10.0
libtpu: 0.0.40
codegen_flags: <defaults>
</compile_context>

<pallas_src>
import jax
import jax.numpy as jnp
from jax.experimental import pallas as pl
from jax.experimental.pallas import tpu as pltpu


_FAST_PATH_ELEMS = 4096  # below this, plain XLA one_hot beats kernel overhead


def _round_up(x: int, m: int) -> int:
    return ((x + m - 1) // m) * m


def _one_hot_kernel(labels_ref, out_ref):
    # labels_ref: (tn, 1) int32 block; out_ref: (tn, tc) block.
    j = pl.program_id(1)
    tc = out_ref.shape[1]
    # Shift the class offset onto the skinny labels column (tn/8 vregs) rather
    # than onto the full (tn, tc) iota (tn*tc/1024 vregs).
    rel = labels_ref[...] - j * tc                                   # (tn, 1)
    cls_ids = jax.lax.broadcasted_iota(jnp.int32, out_ref.shape, 1)  # (tn, tc)
    out_ref[...] = (rel == cls_ids).astype(out_ref.dtype)


def _vmem_budget():
    """(vmem_limit_bytes, per-block byte budget) — generation aware."""
    try:
        cap = pltpu.get_tpu_info().vmem_capacity_bytes
    except Exception:
        cap = 64 * 1024 * 1024
    if cap >= 128 * 1024 * 1024:            # v5e / v6e: 128 MiB physical
        return 64 * 1024 * 1024, 20 * 1024 * 1024
    # v7x: 64 MiB physical per TC — keep double-buffered output well inside it.
    return 32 * 1024 * 1024, 12 * 1024 * 1024


def _one_hot_2d(labels_2d: jax.Array, num_classes: int, out_dtype) -> jax.Array:
    """labels_2d: (N, 1) int32 -> (N, num_classes) out_dtype via Pallas."""
    n = labels_2d.shape[0]
    bytes_per_elem = jnp.dtype(out_dtype).itemsize
    sub = {1: 32, 2: 16, 4: 8}.get(bytes_per_elem, 8)   # sublane tile height

    vmem_limit, block_budget = _vmem_budget()

    # --- class tiling ---------------------------------------------------
    # tc == num_classes when it fits one block (exempt from the 128-lane rule
    # because it equals the full dim -> exact-width writes, no padding).
    # Otherwise lane-dense 2048-wide blocks; ragged final block is masked.
    if num_classes <= 2048:
        tc = num_classes
    else:
        tc = 2048
    grid_c = pl.cdiv(num_classes, tc)

    # --- row tiling -----------------------------------------------------
    if n < sub:
        tn = n                                # equals full dim -> exempt
    else:
        tn_budget = max(sub, (block_budget // (tc * bytes_per_elem) // sub) * sub)
        # Keep >= ~4 row blocks so megacore sharding / pipelined writeback kick in.
        tn_split = _round_up(pl.cdiv(n, 4), sub)
        tn = max(sub, min(tn_budget, tn_split))
    grid_n = pl.cdiv(n, tn)

    return pl.pallas_call(
        _one_hot_kernel,
        out_shape=jax.ShapeDtypeStruct((n, num_classes), out_dtype),
        grid=(grid_n, grid_c),
        in_specs=[pl.BlockSpec((tn, 1), lambda i, j: (i, 0))],
        out_specs=pl.BlockSpec((tn, tc), lambda i, j: (i, j)),
        compiler_params=pltpu.CompilerParams(
            dimension_semantics=("parallel", "parallel"),
            vmem_limit_bytes=vmem_limit,
        ),
    )(labels_2d)


class ToOneHot:
    """JAX/Pallas port of torchlib To_one_hot.

    `dtype` is an opt-in knob (e.g. jnp.bfloat16 halves HBM write bytes on
    this store-bound kernel); default float32 matches torch default-float.
    """

    def __init__(self, num_classes: int, dtype=jnp.float32):
        self.num_classes = num_classes
        self.dtype = dtype

    def __call__(self, x):
        # Accept python int, list of ints, or integer array (0-D, 1-D, (N,1)).
        if isinstance(x, int):
            x = jnp.asarray(x, dtype=jnp.int32)
        elif isinstance(x, list):
            x = jnp.asarray(x, dtype=jnp.int32)
        else:
            x = jnp.asarray(x).astype(jnp.int32)

        if x.ndim == 0:
            # torch path: zeros((num_classes,)); scatter_(0, x, 1)
            return jax.nn.one_hot(x, self.num_classes, dtype=self.dtype)

        if x.ndim == 1:
            x2 = x[:, None]
        elif x.ndim == 2 and x.shape[1] == 1:
            x2 = x
        else:
            raise ValueError(
                "To_one_hot expects scalar, 1-D, or (N, 1) integer input; got "
                f"shape {x.shape}")

        n = x2.shape[0]
        if n == 0 or n * self.num_classes <= _FAST_PATH_ELEMS:
            # Tiny input: pallas_call setup cost dwarfs the work.
            return jax.nn.one_hot(x2[:, 0], self.num_classes, dtype=self.dtype)
        return _one_hot_2d(x2, self.num_classes, self.dtype)


if __name__ == "__main__":
    key = jax.random.PRNGKey(0)

    # --- small inputs (fast path) ---------------------------------------
    num_classes = 10
    batch = 16
    labels = jax.random.randint(key, (batch,), 0, num_classes, dtype=jnp.int32)
    module = ToOneHot(num_classes)

    out = jax.block_until_ready(module(labels))
    ref = jax.nn.one_hot(labels, num_classes, dtype=jnp.float32)
    assert out.shape == (batch, num_classes)
    assert out.dtype == jnp.float32
    assert jnp.array_equal(out, ref)

    out_scalar = jax.block_until_ready(module(3))
    assert out_scalar.shape == (num_classes,)
    assert jnp.array_equal(out_scalar, jax.nn.one_hot(3, num_classes))

    out_list = jax.block_until_ready(module([1, 4, 7]))
    assert out_list.shape == (3, num_classes)
    assert jnp.array_equal(out_list,
                           jax.nn.one_hot(jnp.array([1, 4, 7]), num_classes))

    # --- Pallas path: ragged rows + exact (non-128-multiple) class width --
    c1, n1 = 300, 256
    l1 = jax.random.randint(jax.random.PRNGKey(1), (n1,), 0, c1, dtype=jnp.int32)
    o1 = jax.block_until_ready(ToOneHot(c1)(l1))
    assert o1.shape == (n1, c1)
    assert jnp.array_equal(o1, jax.nn.one_hot(l1, c1, dtype=jnp.float32))

    # --- Pallas path: tile-aligned rows / classes -------------------------
    c2, n2 = 128, 1024
    l2 = jax.random.randint(jax.random.PRNGKey(2), (n2,), 0, c2, dtype=jnp.int32)
    o2 = jax.block_until_ready(ToOneHot(c2)(l2))
    assert o2.shape == (n2, c2)
    assert jnp.array_equal(o2, jax.nn.one_hot(l2, c2, dtype=jnp.float32))

    # --- Pallas path: class dim tiled (>2048) with ragged final class block
    c3, n3 = 2500, 64
    l3 = jax.random.randint(jax.random.PRNGKey(3), (n3,), 0, c3, dtype=jnp.int32)
    o3 = jax.block_until_ready(ToOneHot(c3)(l3))
    assert o3.shape == (n3, c3)
    assert jnp.array_equal(o3, jax.nn.one_hot(l3, c3, dtype=jnp.float32))

    print("KERNEL_OK")
</pallas_src>

<mosaic_0001>
module attributes {stable_mosaic.version = 11 : i64} {
  func.func @_one_hot_kernel(%arg0: i32, %arg1: i32, %arg2: memref<64x1xi32, #tpu.memory_space<vmem>>, %arg3: memref<64x300xf32, #tpu.memory_space<vmem>>) attributes {dimension_semantics = [#tpu.dimension_semantics<parallel>, #tpu.dimension_semantics<parallel>], iteration_bounds = array<i64: 4, 1>, scalar_prefetch = 0 : i64, scratch_operands = 0 : i64, tpu.core_type = #tpu.core_type<tc>, window_params = [{transform_indices = @transform_0, window_bounds = array<i64: 64, 1>}, {transform_indices = @transform_1, window_bounds = array<i64: 64, 300>}]} {
    %c0 = arith.constant 0 : index
    %c0_0 = arith.constant 0 : index
    %0 = vector.load %arg2[%c0, %c0_0] : memref<64x1xi32, #tpu.memory_space<vmem>>, vector<64x1xi32>
    %c300_i32 = arith.constant 300 : i32
    %1 = arith.muli %arg1, %c300_i32 : i32
    %2 = vector.broadcast %1 : i32 to vector<64x1xi32>
    %3 = arith.subi %0, %2 : vector<64x1xi32>
    %4 = tpu.iota {dimensions = array<i32: 1>} : vector<64x300xi32>
    %5 = vector.broadcast %3 : vector<64x1xi32> to vector<64x300xi32>
    %6 = arith.cmpi eq, %5, %4 : vector<64x300xi32>
    %7 = arith.extui %6 : vector<64x300xi1> to vector<64x300xi32>
    %8 = arith.sitofp %7 : vector<64x300xi32> to vector<64x300xf32>
    %c0_1 = arith.constant 0 : index
    %c0_2 = arith.constant 0 : index
    %9 = vector.load %arg3[%c0_1, %c0_2] : memref<64x300xf32, #tpu.memory_space<vmem>>, vector<64x300xf32>
    tpu.vector_store %arg3[%c0_1, %c0_2], %8 {strides = array<i32>} : memref<64x300xf32, #tpu.memory_space<vmem>>, vector<64x300xf32>,
    return
  }
  func.func @transform_0(%arg0: i32, %arg1: i32) -> (i32, i32) {
    %c0_i32 = arith.constant 0 : i32
    %c0_i32_0 = arith.constant 0 : i32
    return %arg0, %c0_i32 : i32, i32
  }
  func.func @transform_1(%arg0: i32, %arg1: i32) -> (i32, i32) {
    %c0_i32 = arith.constant 0 : i32
    return %arg0, %arg1 : i32, i32
  }
}

</mosaic_0001>

<bundles_post_ra>
// kernel: tpu_custom_call.1
= control target key start
LH: loop header
LB: loop body
LE: loop exit
PB: predicated region body
PF: predicated region fallthrough
CT: control target
= control target key end

     0   :  { %s473_s6 = smov 0   ;;  %s475_s7 = smov 0   ;;  %s600_s0 = inlined_call_operand.vmem [shape: s32[256,1], index: 0, kind: input, shape index: {}]   ;;  %s601_s1 = inlined_call_operand.vmem [shape: f32[256,300], index: 1, kind: output, shape index: {}]  }
   0x1   :  { %s477_s8 = smov 0  }
   0x2 LB: > { %s23_s9 = sadd.s32 1, %s455_s7  ;;  %p376_p0 = scmp.ge.s32.totalorder %s459_s8, 1  ;;  %s459_s8 = sphi %s477_s8, %s11_s8   ;;  %s455_s7 = sphi %s475_s7, %s603_s7   ;;  %s451_s6 = sphi %s473_s6, %s602_s6  }
   0x3   : > { %p25_p1 = scmp.ge.s32.totalorder %s23_s9, 4  ;;  %p102_p2 = scmp.lt.s32.totalorder %s459_s8, 5 }
   0x5   : > { %s605_s9 = smov (%p25_p1, %s23_s9), 0  ;;  %p103_p3 = pnand %p376_p0, %p102_p2 }
   0x6   : > { %s377_s10 = sshll.u32 (!%p103_p3), %s451_s6, 3 }
   0x7   : > { %106 = sbr.rel (%p103_p3) target bundleno = 155 (0x9b), region = 24  ;;  %p128_p4 = scmp.lt.s32.totalorder (!%p103_p3), %s377_s10, 31 }
   0xc   : > { %v461_v0 = vmov 0   ;;  %s607_s10 = smov (!%p128_p4, %s377_s10), 31  ;;  %v163_v9 = vlaneseq  ;;  %v462_v14 = vmov 0.0   ;;  %vm265_vm3 = vcmask 359424  }
   0xd   : > { %435 = vset.pattern.permute.xlu1 %v461_v0  ;;  %434 = vset.pattern.permute.xlu0 %v461_v0  ;;  %s378_s11 = sshll.u32 %s607_s10, 3  ;;  %s407_s15 = smul.u32 24, %s607_s10 }
   0xe   : > { %436 = vset.pattern.permute.xlu2 %v461_v0  ;;  %s131_s14 = scalar_lea.vmem %s600_s0, %s378_s11  ;;  %v497_v10 = vand.u32 127, %v163_v9 }
   0xf   : > { %v147_v1 = vld [vmem:[%s131_s14 + $0x10] sm:$0xff]  ;;  %v145_v2 = vld [vmem:[%s131_s14] sm:$0xff]  ;;  %v148_v4 = vld [vmem:[%s131_s14 + $0x18] sm:$0xff]  ;;  %s512_s18 = scalar_lea.vmem %s601_s1, %s407_s15 }
  0x10   : > { %174 = vperm.xlu1 %435, %v147_v1   ;;  %168 = vperm.xlu0 %434, %v145_v2   ;;  %v149_v3 = vld [vmem:[%s131_s14 + $0x20] sm:$0xff]  ;;  %v146_v5 = vld [vmem:[%s131_s14 + $0x8] sm:$0xff]  ;;  %v152_v7 = vld [vmem:[%s131_s14 + $0x38] sm:$0xff]  ;;  %v501_v11 = vadd.s32 128, %v497_v10  ;;  %v504_v12 = vadd.s32 256, %v497_v10 }
  0x11   : > { %180 = vperm.xlu2 %436, %v149_v3   ;;  %v150_v6 = vld [vmem:[%s131_s14 + $0x28] sm:$0xff]  ;;  %v151_v8 = vld [vmem:[%s131_s14 + $0x30] sm:$0xff] }
  0x18   : > { %177 = vperm.xlu1 %435, %v148_v4   ;;  %171 = vperm.xlu0 %434, %v146_v5  }
  0x19   : > { %183 = vperm.xlu2 %436, %v150_v6  }
  0x20   : > { %189 = vperm.xlu1 %435, %v152_v7   ;;  %186 = vperm.xlu0 %434, %v151_v8  }
  0x6b   : > { %v181_v13 = vpop.permute.xlu2 %180 }
  0x6c   : > { %vm203_vm0 = vcmp.eq.s32.totalorder %v181_v13, %v497_v10  ;;  %vm204_vm1 = vcmp.eq.s32.totalorder %v181_v13, %v501_v11  ;;  %vm205_vm2 = vcmp.eq.s32.totalorder %v181_v13, %v504_v12 }
  0x6d   : > { %v393_v15 = vsel %vm203_vm0, 1.0, %v462_v14  ;;  %v394_v16 = vsel %vm204_vm1, 1.0, %v462_v14  ;;  %v395_v17 = vsel %vm205_vm2, 1.0, %v462_v14 }
  0x6e   : > { %276 = vst [vmem:[%s512_s18 + $0x60] sm:$0xff] %v393_v15 }
  0x6f   : > { %277 = vst [vmem:[%s512_s18 + $0x68] sm:$0xff] %v394_v16 }
  0x70   : > { %278 = vst.msk [vmem:[%s512_s18 + $0x70] sm:$0xff] %vm265_vm3, %v395_v17 }
  0x73   : > { %v184_v18 = vpop.permute.xlu2 %183 }
  0x74   : > { %vm206_vm4 = vcmp.eq.s32.totalorder %v184_v18, %v497_v10  ;;  %vm207_vm5 = vcmp.eq.s32.totalorder %v184_v18, %v501_v11  ;;  %vm208_vm6 = vcmp.eq.s32.totalorder %v184_v18, %v504_v12 }
  0x75   : > { %v396_v19 = vsel %vm206_vm4, 1.0, %v462_v14  ;;  %v397_v20 = vsel %vm207_vm5, 1.0, %v462_v14  ;;  %v398_v21 = vsel %vm208_vm6, 1.0, %v462_v14 }
  0x76   : > { %279 = vst [vmem:[%s512_s18 + $0x78] sm:$0xff] %v396_v19 }
  0x77   : > { %280 = vst [vmem:[%s512_s18 + $0x80] sm:$0xff] %v397_v20 }
  0x78   : > { %281 = vst.msk [vmem:[%s512_s18 + $0x88] sm:$0xff] %vm265_vm3, %v398_v21 }
  0x82   : > { %v175_v22 = vpop.permute.xlu1 %174  ;;  %v169_v23 = vpop.permute.xlu0 %168 }
  0x83   : > { %vm197_vm7 = vcmp.eq.s32.totalorder %v175_v22, %v497_v10  ;;  %vm198_vm8 = vcmp.eq.s32.totalorder %v175_v22, %v501_v11  ;;  %vm199_vm9 = vcmp.eq.s32.totalorder %v175_v22, %v504_v12  ;;  %vm191_vm10 = vcmp.eq.s32.totalorder %v169_v23, %v497_v10 }
  0x84   : > { %v387_v24 = vsel %vm197_vm7, 1.0, %v462_v14  ;;  %v388_v25 = vsel %vm198_vm8, 1.0, %v462_v14  ;;  %v389_v26 = vsel %vm199_vm9, 1.0, %v462_v14  ;;  %vm192_vm11 = vcmp.eq.s32.totalorder %v169_v23, %v501_v11 }
  0x85   : > { %270 = vst [vmem:[%s512_s18 + $0x30] sm:$0xff] %v387_v24  ;;  %vm193_vm12 = vcmp.eq.s32.totalorder %v169_v23, %v504_v12  ;;  %v381_v27 = vsel %vm191_vm10, 1.0, %v462_v14  ;;  %v382_v28 = vsel %vm192_vm11, 1.0, %v462_v14 }
  0x86   : > { %271 = vst [vmem:[%s512_s18 + $0x38] sm:$0xff] %v388_v25  ;;  %v383_v29 = vsel %vm193_vm12, 1.0, %v462_v14 }
  0x87   : > { %272 = vst.msk [vmem:[%s512_s18 + $0x40] sm:$0xff] %vm265_vm3, %v389_v26 }
  0x88   : > { %263 = vst [vmem:[%s512_s18] sm:$0xff] %v381_v27 }
  0x89   : > { %264 = vst [vmem:[%s512_s18 + $0x8] sm:$0xff] %v382_v28 }
  0x8a   : > { %266 = vst.msk [vmem:[%s512_s18 + $0x10] sm:$0xff] %vm265_vm3, %v383_v29  ;;  %v178_v30 = vpop.permute.xlu1 %177  ;;  %v172_v31 = vpop.permute.xlu0 %171 }
  0x8b   : > { %vm200_vm13 = vcmp.eq.s32.totalorder %v178_v30, %v497_v10  ;;  %vm201_vm14 = vcmp.eq.s32.totalorder %v178_v30, %v501_v11  ;;  %vm202_vm15 = vcmp.eq.s32.totalorder %v178_v30, %v504_v12  ;;  %vm194_vm0 = vcmp.eq.s32.totalorder %v172_v31, %v497_v10 }
  0x8c   : > { %v390_v32 = vsel %vm200_vm13, 1.0, %v462_v14  ;;  %v391_v33 = vsel %vm201_vm14, 1.0, %v462_v14  ;;  %v392_v34 = vsel %vm202_vm15, 1.0, %v462_v14  ;;  %vm195_vm1 = vcmp.eq.s32.totalorder %v172_v31, %v501_v11 }
  0x8d   : > { %273 = vst [vmem:[%s512_s18 + $0x48] sm:$0xff] %v390_v32  ;;  %vm196_vm2 = vcmp.eq.s32.totalorder %v172_v31, %v504_v12  ;;  %v384_v35 = vsel %vm194_vm0, 1.0, %v462_v14  ;;  %v385_v36 = vsel %vm195_vm1, 1.0, %v462_v14 }
  0x8e   : > { %274 = vst [vmem:[%s512_s18 + $0x50] sm:$0xff] %v391_v33  ;;  %v386_v37 = vsel %vm196_vm2, 1.0, %v462_v14 }
  0x8f   : > { %275 = vst.msk [vmem:[%s512_s18 + $0x58] sm:$0xff] %vm265_vm3, %v392_v34 }
  0x90   : > { %267 = vst [vmem:[%s512_s18 + $0x18] sm:$0xff] %v384_v35 }
  0x91   : > { %268 = vst [vmem:[%s512_s18 + $0x20] sm:$0xff] %v385_v36 }
  0x92   : > { %269 = vst.msk [vmem:[%s512_s18 + $0x28] sm:$0xff] %vm265_vm3, %v386_v37  ;;  %v190_v38 = vpop.permute.xlu1 %189  ;;  %v187_v39 = vpop.permute.xlu0 %186 }
  0x93   : > { %vm212_vm4 = vcmp.eq.s32.totalorder %v190_v38, %v497_v10  ;;  %vm213_vm5 = vcmp.eq.s32.totalorder %v190_v38, %v501_v11  ;;  %vm214_vm6 = vcmp.eq.s32.totalorder %v190_v38, %v504_v12  ;;  %vm209_vm7 = vcmp.eq.s32.totalorder %v187_v39, %v497_v10 }
  0x94   : > { %v402_v40 = vsel %vm212_vm4, 1.0, %v462_v14  ;;  %v403_v41 = vsel %vm213_vm5, 1.0, %v462_v14  ;;  %v404_v42 = vsel %vm214_vm6, 1.0, %v462_v14  ;;  %vm210_vm8 = vcmp.eq.s32.totalorder %v187_v39, %v501_v11 }
  0x95   : > { %285 = vst [vmem:[%s512_s18 + $0xa8] sm:$0xff] %v402_v40  ;;  %vm211_vm9 = vcmp.eq.s32.totalorder %v187_v39, %v504_v12  ;;  %v399_v43 = vsel %vm209_vm7, 1.0, %v462_v14  ;;  %v400_v44 = vsel %vm210_vm8, 1.0, %v462_v14 }
  0x96   : > { %286 = vst [vmem:[%s512_s18 + $0xb0] sm:$0xff] %v403_v41  ;;  %v401_v45 = vsel %vm211_vm9, 1.0, %v462_v14 }
  0x97   : > { %287 = vst.msk [vmem:[%s512_s18 + $0xb8] sm:$0xff] %vm265_vm3, %v404_v42 }
  0x98   : > { %282 = vst [vmem:[%s512_s18 + $0x90] sm:$0xff] %v399_v43 }
  0x99   : > { %283 = vst [vmem:[%s512_s18 + $0x98] sm:$0xff] %v400_v44 }
  0x9a   : > { %284 = vst.msk [vmem:[%s512_s18 + $0xa0] sm:$0xff] %vm265_vm3, %v401_v45 }
  0x9b PF: > { %s11_s8 = sadd.s32 1, %s459_s8   ;;  %s602_s6 = smov %s455_s7 }
  0x9c   : > { %p8_p5 = scmp.ge.s32.totalorder %s11_s8, 6   ;;  %s603_s7 = smov %s605_s9 }
  0x9e   :  { %10 = sbr.rel (!%p8_p5) target bundleno = 2 (0x2), region = 54 }

</bundles_post_ra>
